<compile_context>
chip_gen: v7x
topology: tpu7x:2x2x1
jax: 0.10.0
libtpu: 0.0.40
codegen_flags: <defaults>
</compile_context>

<pallas_src>
import functools

import jax
import jax.numpy as jnp
from jax.experimental import pallas as pl
from jax.experimental.pallas import tpu as pltpu


def temporal_attention_kernel(x_ref, w1t_ref, b1_ref, w2t_ref, b2_ref, o_ref,
                              *, b_tile):
    # x_ref / o_ref: (b_tile, C, Tt) blocks in native (B, C, T) layout.
    # w1t: (r, C), b1: (r, 1), w2t: (C, r), b2: (C, 1) -- full arrays in VMEM.
    w1t = w1t_ref[...]
    b1 = b1_ref[...]
    w2t = w2t_ref[...]
    b2 = b2_ref[...]
    # Small static unroll over the batch rows of this block (b_tile is tiny).
    for b in range(b_tile):
        x = x_ref[b].astype(jnp.float32)                       # (C, Tt), lanes = time
        h = jnp.dot(w1t, x, preferred_element_type=jnp.float32) + b1   # (r, Tt)
        h = jnp.maximum(h, 0.0)                                # ReLU
        a = jnp.dot(w2t, h, preferred_element_type=jnp.float32) + b2   # (C, Tt)
        a = jax.nn.sigmoid(a)                                  # gate
        o_ref[b] = (x * a).astype(o_ref.dtype)


def _pick_tiles(B, C, T, itemsize):
    """Choose (b_tile, t_tile).

    t_tile: 128-multiple (or full T when T < 128), sized so one block is ~3 MiB
    => pipelined working set (2 in + 2 out blocks + weights) stays under ~12 MiB
    (fits v5e's 16 MiB scoped-VMEM default; v6e/v7x have 32 MiB).
    Never collapses the grid to a single step (v7x dual TensorCore sharding).
    b_tile > 1 only when one time tile already covers all of T (short-T shapes).
    """
    per_block_budget = 3 * 1024 * 1024
    bytes_per_lane = max(C, 1) * itemsize

    if T < 128:
        t_tile = T                                        # full-extent last dim: legal
    else:
        max_lanes = max(128, (per_block_budget // bytes_per_lane) // 128 * 128)
        t_tile = min(max_lanes, (T // 128) * 128)         # largest fitting 128-multiple

    # Keep >= 2 parallel grid steps when possible (only binds when B == 1).
    while B * pl.cdiv(T, t_tile) < 2 and t_tile > 128:
        t_tile = max(128, (t_tile // 2) // 128 * 128)

    b_tile = 1
    if pl.cdiv(T, t_tile) == 1:
        # Short-T / large-B: amortize the per-grid-step overhead over several
        # batch rows (cap keeps the in-kernel static unroll small).
        b_tile = min(B, 8,
                     max(1, per_block_budget // max(1, C * t_tile * itemsize)))
        if B >= 2:
            while pl.cdiv(B, b_tile) < 2 and b_tile > 1:
                b_tile = max(1, (b_tile + 1) // 2)
    return b_tile, t_tile


def temporal_attention(x, w1, b1, w2, b2):
    """x: (B, C, T); w1: (C, r); b1: (r,); w2: (r, C); b2: (C,). Returns (B, C, T)."""
    B, C, T = x.shape
    r = w1.shape[1]

    # Tiny one-off weight reshapes (C*r elements) -- negligible glue.
    w1t = jnp.transpose(w1).astype(jnp.float32)               # (r, C)
    w2t = jnp.transpose(w2).astype(jnp.float32)               # (C, r)
    b1_2d = b1.astype(jnp.float32).reshape(r, 1)
    b2_2d = b2.astype(jnp.float32).reshape(C, 1)

    b_tile, t_tile = _pick_tiles(B, C, T, x.dtype.itemsize)
    grid = (pl.cdiv(B, b_tile), pl.cdiv(T, t_tile))

    kernel = functools.partial(temporal_attention_kernel, b_tile=b_tile)

    cost = pl.CostEstimate(
        flops=4 * B * T * C * r,                               # two tiny contractions
        transcendentals=B * C * T,                             # sigmoid per gate element
        bytes_accessed=2 * B * C * T * x.dtype.itemsize + 4 * (2 * C * r + C + r),
    )

    return pl.pallas_call(
        kernel,
        out_shape=jax.ShapeDtypeStruct((B, C, T), x.dtype),
        grid=grid,
        in_specs=[
            pl.BlockSpec((b_tile, C, t_tile), lambda b, t: (b, 0, t)),
            pl.BlockSpec((r, C), lambda b, t: (0, 0)),
            pl.BlockSpec((r, 1), lambda b, t: (0, 0)),
            pl.BlockSpec((C, r), lambda b, t: (0, 0)),
            pl.BlockSpec((C, 1), lambda b, t: (0, 0)),
        ],
        out_specs=pl.BlockSpec((b_tile, C, t_tile), lambda b, t: (b, 0, t)),
        compiler_params=pltpu.CompilerParams(
            dimension_semantics=("parallel", "parallel")),
        cost_estimate=cost,
    )(x, w1t, b1_2d, w2t, b2_2d)


def reference(x, w1, b1, w2, b2):
    x_perm = jnp.transpose(x, (0, 2, 1))                       # (B, T, C)
    h = jnp.maximum(x_perm @ w1 + b1, 0.0)
    a = jax.nn.sigmoid(h @ w2 + b2)
    return x * jnp.transpose(a, (0, 2, 1))


if __name__ == "__main__":
    # in_channels=16 -> reduction = max(1, 16 // 8) = 2 (matches the module).
    B, C, T = 2, 16, 1024
    r = max(1, C // 8)

    key = jax.random.PRNGKey(0)
    kx, kw1, kb1, kw2, kb2 = jax.random.split(key, 5)

    x = jax.random.normal(kx, (B, C, T), dtype=jnp.float32)
    # Deterministic synthetic params (PyTorch Linear-style uniform init scale).
    lim1 = 1.0 / (C ** 0.5)
    lim2 = 1.0 / (r ** 0.5)
    w1 = jax.random.uniform(kw1, (C, r), jnp.float32, -lim1, lim1)
    b1 = jax.random.uniform(kb1, (r,), jnp.float32, -lim1, lim1)
    w2 = jax.random.uniform(kw2, (r, C), jnp.float32, -lim2, lim2)
    b2 = jax.random.uniform(kb2, (C,), jnp.float32, -lim2, lim2)

    # Main check.
    out = jax.block_until_ready(temporal_attention(x, w1, b1, w2, b2))
    ref = reference(x, w1, b1, w2, b2)
    assert out.shape == (B, C, T)
    assert jnp.allclose(out, ref, atol=1e-5, rtol=1e-5)

    # Short-T / large-B path (exercises batch tiling: b_tile > 1).
    x2 = jax.random.normal(kw1, (8, C, 128), dtype=jnp.float32)
    out2 = jax.block_until_ready(temporal_attention(x2, w1, b1, w2, b2))
    assert jnp.allclose(out2, reference(x2, w1, b1, w2, b2), atol=1e-5, rtol=1e-5)

    # Ragged time axis (T % 128 != 0): 128-multiple tiles + Pallas edge masking.
    x3 = jax.random.normal(kw2, (2, C, 200), dtype=jnp.float32)
    out3 = jax.block_until_ready(temporal_attention(x3, w1, b1, w2, b2))
    assert jnp.allclose(out3, reference(x3, w1, b1, w2, b2), atol=1e-5, rtol=1e-5)

    print("KERNEL_OK")
</pallas_src>

<mosaic_0001>
module attributes {stable_mosaic.version = 11 : i64} {
  func.func @temporal_attention_kernel(%arg0: i32, %arg1: i32, %arg2: memref<1x16x1024xf32, #tpu.memory_space<vmem>>, %arg3: memref<2x16xf32, #tpu.memory_space<vmem>>, %arg4: memref<2x1xf32, #tpu.memory_space<vmem>>, %arg5: memref<16x2xf32, #tpu.memory_space<vmem>>, %arg6: memref<16x1xf32, #tpu.memory_space<vmem>>, %arg7: memref<1x16x1024xf32, #tpu.memory_space<vmem>>) attributes {dimension_semantics = [#tpu.dimension_semantics<parallel>, #tpu.dimension_semantics<parallel>], iteration_bounds = array<i64: 2, 1>, scalar_prefetch = 0 : i64, scratch_operands = 0 : i64, tpu.core_type = #tpu.core_type<tc>, window_params = [{transform_indices = @transform_0, window_bounds = array<i64: 1, 16, 1024>}, {pipeline_mode = #tpu.pipeline_mode<synchronous>, transform_indices = @transform_1, window_bounds = array<i64: 2, 16>}, {pipeline_mode = #tpu.pipeline_mode<synchronous>, transform_indices = @transform_2, window_bounds = array<i64: 2, 1>}, {pipeline_mode = #tpu.pipeline_mode<synchronous>, transform_indices = @transform_3, window_bounds = array<i64: 16, 2>}, {pipeline_mode = #tpu.pipeline_mode<synchronous>, transform_indices = @transform_4, window_bounds = array<i64: 16, 1>}, {transform_indices = @transform_5, window_bounds = array<i64: 1, 16, 1024>}]} {
    %c0 = arith.constant 0 : index
    %c0_0 = arith.constant 0 : index
    %0 = vector.load %arg3[%c0, %c0_0] : memref<2x16xf32, #tpu.memory_space<vmem>>, vector<2x16xf32>
    %c0_1 = arith.constant 0 : index
    %c0_2 = arith.constant 0 : index
    %1 = vector.load %arg4[%c0_1, %c0_2] : memref<2x1xf32, #tpu.memory_space<vmem>>, vector<2x1xf32>
    %c0_3 = arith.constant 0 : index
    %c0_4 = arith.constant 0 : index
    %2 = vector.load %arg5[%c0_3, %c0_4] : memref<16x2xf32, #tpu.memory_space<vmem>>, vector<16x2xf32>
    %c0_5 = arith.constant 0 : index
    %c0_6 = arith.constant 0 : index
    %3 = vector.load %arg6[%c0_5, %c0_6] : memref<16x1xf32, #tpu.memory_space<vmem>>, vector<16x1xf32>
    %c0_7 = arith.constant 0 : index
    %c0_8 = arith.constant 0 : index
    %c0_9 = arith.constant 0 : index
    %4 = vector.load %arg2[%c0_7, %c0_8, %c0_9] : memref<1x16x1024xf32, #tpu.memory_space<vmem>>, vector<1x16x1024xf32>
    %5 = vector.shape_cast %4 : vector<1x16x1024xf32> to vector<16x1024xf32>
    %cst = arith.constant dense<0.000000e+00> : vector<2x1024xf32>
    %6 = tpu.matmul %0, %5, %cst {dimension_numbers = #tpu.dot_dimension_numbers<[1], [0], [0], [1], [0, 0, 1, 1], [], []>} : vector<2x16xf32>, vector<16x1024xf32>, vector<2x1024xf32> -> vector<2x1024xf32>
    %7 = vector.broadcast %1 : vector<2x1xf32> to vector<2x1024xf32>
    %8 = arith.addf %6, %7 : vector<2x1024xf32>
    %cst_10 = arith.constant 0.000000e+00 : f32
    %9 = vector.broadcast %cst_10 : f32 to vector<2x1024xf32>
    %10 = arith.maximumf %8, %9 : vector<2x1024xf32>
    %cst_11 = arith.constant dense<0.000000e+00> : vector<16x1024xf32>
    %11 = tpu.matmul %2, %10, %cst_11 {dimension_numbers = #tpu.dot_dimension_numbers<[1], [0], [0], [1], [0, 0, 1, 1], [], []>} : vector<16x2xf32>, vector<2x1024xf32>, vector<16x1024xf32> -> vector<16x1024xf32>
    %12 = vector.broadcast %3 : vector<16x1xf32> to vector<16x1024xf32>
    %13 = arith.addf %11, %12 : vector<16x1024xf32>
    %14 = arith.negf %13 : vector<16x1024xf32>
    %15 = math.exp %14 : vector<16x1024xf32>
    %cst_12 = arith.constant 1.000000e+00 : f32
    %16 = vector.broadcast %cst_12 : f32 to vector<16x1024xf32>
    %17 = arith.addf %16, %15 : vector<16x1024xf32>
    %18 = arith.divf %16, %17 : vector<16x1024xf32>
    %19 = arith.mulf %5, %18 : vector<16x1024xf32>
    %c0_13 = arith.constant 0 : index
    %c0_14 = arith.constant 0 : index
    %c0_15 = arith.constant 0 : index
    %20 = vector.load %arg7[%c0_13, %c0_14, %c0_15] : memref<1x16x1024xf32, #tpu.memory_space<vmem>>, vector<1x16x1024xf32>
    %21 = vector.shape_cast %20 : vector<1x16x1024xf32> to vector<16x1024xf32>
    %22 = vector.shape_cast %19 : vector<16x1024xf32> to vector<1x16x1024xf32>
    tpu.vector_store %arg7[%c0_13, %c0_14, %c0_15], %22 {strides = array<i32>} : memref<1x16x1024xf32, #tpu.memory_space<vmem>>, vector<1x16x1024xf32>,
    return
  }
  func.func @transform_0(%arg0: i32, %arg1: i32) -> (i32, i32, i32) {
    %c0_i32 = arith.constant 0 : i32
    %c0_i32_0 = arith.constant 0 : i32
    return %arg0, %c0_i32, %arg1 : i32, i32, i32
  }
  func.func @transform_1(%arg0: i32, %arg1: i32) -> (i32, i32) {
    %c0_i32 = arith.constant 0 : i32
    %c0_i32_0 = arith.constant 0 : i32
    %c0_i32_1 = arith.constant 0 : i32
    return %c0_i32, %c0_i32_0 : i32, i32
  }
  func.func @transform_2(%arg0: i32, %arg1: i32) -> (i32, i32) {
    %c0_i32 = arith.constant 0 : i32
    %c0_i32_0 = arith.constant 0 : i32
    %c0_i32_1 = arith.constant 0 : i32
    return %c0_i32, %c0_i32_0 : i32, i32
  }
  func.func @transform_3(%arg0: i32, %arg1: i32) -> (i32, i32) {
    %c0_i32 = arith.constant 0 : i32
    %c0_i32_0 = arith.constant 0 : i32
    %c0_i32_1 = arith.constant 0 : i32
    return %c0_i32, %c0_i32_0 : i32, i32
  }
  func.func @transform_4(%arg0: i32, %arg1: i32) -> (i32, i32) {
    %c0_i32 = arith.constant 0 : i32
    %c0_i32_0 = arith.constant 0 : i32
    %c0_i32_1 = arith.constant 0 : i32
    return %c0_i32, %c0_i32_0 : i32, i32
  }
  func.func @transform_5(%arg0: i32, %arg1: i32) -> (i32, i32, i32) {
    %c0_i32 = arith.constant 0 : i32
    %c0_i32_0 = arith.constant 0 : i32
    return %arg0, %c0_i32, %arg1 : i32, i32, i32
  }
}

</mosaic_0001>

<bundles_post_ra>
// kernel: tpu_custom_call.1
= control target key start
LH: loop header
LB: loop body
LE: loop exit
PB: predicated region body
PF: predicated region fallthrough
CT: control target
= control target key end

     0   :  { %10 = vsyncpa [#allocation3], 0  ;;  %s1862_s0 = inlined_call_operand.hbm [shape: f32[2,16,1024], index: 0, kind: input, shape index: {}]   ;;  %s1863_s1 = inlined_call_operand.vmem [shape: f32[2,16], index: 1, kind: input, shape index: {}]   ;;  %s1864_s2 = inlined_call_operand.vmem [shape: f32[2,1], index: 2, kind: input, shape index: {}]   ;;  %s1865_s3 = inlined_call_operand.vmem [shape: f32[16,2], index: 3, kind: input, shape index: {}]   ;;  %s1866_s4 = inlined_call_operand.vmem [shape: f32[16,1], index: 4, kind: input, shape index: {}]   ;;  %s1867_s5 = inlined_call_operand.hbm [shape: f32[2,16,1024], index: 5, kind: output, shape index: {}]  }
   0x1   :  { %12 = vsyncpa [#allocation3 + $0x1], 0 }
   0x2   :  { %13 = vsyncpa [#allocation4], 0 }
   0x3   :  { %15 = vsyncpa [#allocation4 + $0x1], 0  ;;  %s1522_s18 = smov 0   ;;  %s1524_s19 = smov 0  }
   0x4   :  { %s1526_s20 = smov 0   ;;  %s1528_s21 = smov 0  }
   0x5   :  { %s1530_s22 = smov 0   ;;  %s1532_s23 = smov 0  }
   0x6 LB: > { %s1167_s24 = sadd.s32 4294967295, %s1482_s23   ;;  %s1168_s25 = sadd.s32 4294967294, %s1482_s23   ;;  %s1482_s23 = sphi %s1532_s23, %s21_s23   ;;  %s1478_s22 = sphi %s1530_s22, %s1882_s22   ;;  %s1474_s21 = sphi %s1528_s21, %s1881_s21   ;;  %s1470_s20 = sphi %s1526_s20, %s1880_s20   ;;  %s1466_s19 = sphi %s1524_s19, %s1879_s19   ;;  %s1462_s18 = sphi %s1522_s18, %s1878_s18  }
   0x7   : > { %s33_s26 = sadd.s32 1, %s1478_s22  ;;  %s42_s27 = sadd.s32 1, %s1470_s20 }
   0x8   : > { %p35_p0 = scmp.ge.s32.totalorder %s33_s26, 2  ;;  %p49_p1 = scmp.ne.s32.totalorder %s1470_s20, %s1466_s19 }
   0x9   : > { %p50_p2 = scmp.eq.s32.totalorder %s1482_s23, 0  ;;  %p55_p3 = scmp.ne.s32.totalorder %s1466_s19, %s1462_s18 }
   0xa   : > { %s1884_s26 = smov (%p35_p0, %s33_s26), 0  ;;  %p56_p5 = scmp.eq.s32.totalorder %s1167_s24, 0 }
   0xb   : > { %p1563_p4 = por %p50_p2, %p49_p1  ;;  %s37_s29 = ssub.s32 %s1478_s22, %s1884_s26 }
   0xc   : > { %p165_p6 = scmp.eq.s32.totalorder %s1167_s24, 1  ;;  %p40_p7 = scmp.eq.s32.totalorder %s37_s29, 0 }
   0xd   : > { %p1569_p8 = por %p56_p5, %p55_p3  ;;  %p171_p10 = scmp.eq.s32.totalorder %s1168_s25, 1 }
   0xe   : > { %p1573_p9 = por %p165_p6, %p49_p1  ;;  %p1248_p13 = scmp.lt.s32.totalorder %s1482_s23, 2 }
   0xf   : > { %s1578_s7 = scalar_select %p40_p7, %s1470_s20, %s42_s27  }
  0x10   : > { %s1871_s6 = scalar_select %p1573_p9, 1, 0 }
  0x11   : > { %p1580_p11 = por %p171_p10, %p55_p3  ;;  %s203_s9 = sand.u32 1, %s1470_s20  }
  0x12   : > { %s1171_s10 = sshll.u32 %s203_s9, 7  ;;  %s1218_s11 = sshll.u32 %s1478_s22, 11 }
  0x13   : > { %s1872_s8 = scalar_select %p1580_p11, 1, 0 }
  0x14   : > { %s1591_s14 = scalar_lea.hbm %s1862_s0, %s1218_s11  ;;  %s207_s15 = scalar_lea.vmem [#allocation2], %s1171_s10 }
  0x15   : > { %s216_s16 = sshll.u32 %s207_s15, 4  ;;  %p1597_p0 = pnand %p1248_p13, %p1563_p4  ;;  %s1593_s16 = int_to_ptr.vmem [resolvable:$true] %s216_s16 }
  0x16   : > { %s1602_s24 = scalar_lea.sflag [#allocation3], %s203_s9  ;;  %s1370_s25 = scalar_lea.hbm %s1591_s14, 2048 }
  0x17   : > { %p1371_p2 = scmp.ne.s32.totalorder %s1591_s14, %s1370_s25  ;;  %p1372_p3 = pneg %p1597_p0 }
  0x18   : > { %s1375_s28 = scalar_lea.hbm %s1862_s0, 4096  ;;  %p1376_p4 = scmp.lt.u32.totalorder %s1591_s14, %s1862_s0 }
  0x19   : > { %p1373_p5 = pnand %p1372_p3, %p1371_p2  ;;  %p1377_p7 = scmp.lt.u32.totalorder %s1375_s28, %s1370_s25 }
  0x1a   : > { %p1379_p13 = scmp.lt.u32.totalorder %s1370_s25, %s1591_s14 }
  0x1b   : > { %p1374_p6 = pneg %p1373_p5  ;;  %p1378_p10 = por %p1377_p7, %p1376_p4 }
  0x1d   : > { %p1380_p12 = por %p1379_p13, %p1378_p10 }
  0x1f   : > { %p1381_p1 = pnand %p1380_p12, %p1374_p6 }
  0x21   : > { %1384 = shalt.err (!%p1381_p1)
}
  0x22   : > { %s1385_s9 = scalar_lea.vmem %s1593_s16, 2048  ;;  %s1484_s12 = smov [#allocation2]  }
  0x23   : > { %p1386_p2 = scmp.ne.s32.totalorder %s1593_s16, %s1385_s9  ;;  %s1390_s13 = sshll.u32 %s1484_s12, 4  ;;  %s1391_s13 = int_to_ptr.vmem [resolvable:$false] %s1390_s13 }
  0x24   : > { %s1392_s15 = scalar_lea.vmem %s1391_s13, 4096  ;;  %p1393_p9 = scmp.lt.s32.totalorder %s1593_s16, %s1391_s13 }
  0x25   : > { %p1388_p5 = pnand %p1386_p2, %p1372_p3  ;;  %p1394_p4 = scmp.lt.s32.totalorder %s1392_s15, %s1385_s9 }
  0x27   : > { %p1389_p11 = pneg %p1388_p5  ;;  %p1395_p7 = por %p1394_p4, %p1393_p9 }
  0x29   : > { %p1396_p10 = pnand %p1395_p7, %p1389_p11 }
  0x2b   : > { %1399 = shalt.err (!%p1396_p10)
}
  0x2c   : > { %s1485_s25 = smov 1024   ;;  %s1486_s27 = smov 64  }
  0x2d   : > { %1243 = dma.hbm_to_vmem [thread:$0]  (!%p1597_p0), %s1591_s14, 2048, %s1593_s16, %s1602_s24, %s1485_s25, %s1485_s25, %s1486_s27  }
  0x2e   : > { %p224_p12 = scmp.lt.s32.totalorder %s1482_s23, 3  ;;  %p1874_p1 = scmp.ge.s32.totalorder %s1482_s23, 1 }
  0x30   : > { %p225_p3 = pnand %p1874_p1, %p224_p12 }
  0x31   : > { %s1634_s29 = sand.u32 (!%p225_p3), 1, %s1466_s19  }
  0x32   : > { %228 = sbr.rel (%p225_p3) target bundleno = 570 (0x23a), region = 40  ;;  %s1175_s28 = sshll.u32 (!%p225_p3), %s1634_s29, 7 }
  0x33   : > { %s231_s10 = scalar_lea.sflag (!%p225_p3), [#allocation3], %s1634_s29  ;;  %s1640_s11 = scalar_lea.vmem (!%p225_p3), [#allocation2], %s1175_s28 }
  0x39   : > { %1453 = dma.done.wait (%p1569_p8), %s231_s10, 2048  }
  0x3a   : > { %1455 = vsyncadd (%p1569_p8), %s231_s10, 4294965248  ;;  %v1487_v0 = vmov 0.0   ;;  %v1488_v1 = vmov 0   ;;  %v1649_v2 = vld [vmem:[%s1640_s11 + $0x8] sm:$0xff]  ;;  %v1655_v4 = vld [vmem:[%s1640_s11 + $0x18] sm:$0xff]  ;;  %vm290_vm0 = vcmask 130048  }
  0x3b   : > { %358 = vmatprep.mubr.f32.mxu0 %v1487_v0  ;;  %429 = vmatprep.mubr.f32.mxu1 %v1487_v0  ;;  %v1652_v3 = vld [vmem:[%s1640_s11 + $0x48] sm:$0xff]  ;;  %v1660_v6 = vld [vmem:[%s1640_s11 + $0x58] sm:$0xff]  ;;  %v1663_v7 = vld [vmem:[%s1640_s11] sm:$0xff]  ;;  %vm603_vm1 = vcmask 1041408   ;;  %vm596_vm2 = vcmask 15360   ;;  %p1875_p9 = scmp.ne.s32.totalorder %s1871_s6, 0 }
  0x3c   : > { %1304 = vset.pattern.permute.xlu0 %v1488_v1  ;;  %1305 = vset.pattern.permute.xlu1 %v1488_v1  ;;  %v1220_v5 = vpack.c.bf16 %v1652_v3, %v1649_v2  ;;  %v1666_v8 = vld [vmem:[%s1640_s11 + $0x40] sm:$0xff]  ;;  %v1224_v9 = vpack.c.bf16 %v1660_v6, %v1655_v4  ;;  %v1673_v11 = vld [vmem:[%s1640_s11 + $0x10] sm:$0xff]  ;;  %v1684_v15 = vld [vmem:[%s1640_s11 + $0x28] sm:$0xff]  ;;  %s1489_s9 = smov [#allocation5]  }
  0x3d   : > { %v1222_v10 = vpack.c.bf16 %v1666_v8, %v1663_v7  ;;  %v1676_v12 = vld [vmem:[%s1640_s11 + $0x50] sm:$0xff]  ;;  %v263_v13 = vld [vmem:[%s1863_s1] sm:$0x3]  ;;  %v1687_v16 = vld [vmem:[%s1640_s11 + $0x68] sm:$0xff]  ;;  %s1404_s12 = sshll.u32 %s1489_s9, 4  ;;  %s1405_s12 = int_to_ptr.vmem [resolvable:$false] %s1404_s12 }
  0x3e   : > { %1221 = vmatprep.subr.bf16.mxu0 %v1220_v5  ;;  %v1226_v14 = vpack.c.bf16 %v1676_v12, %v1673_v11  ;;  %v1690_v17 = vld [vmem:[%s1640_s11 + $0x38] sm:$0xff]  ;;  %1225 = vmatprep.subr.bf16.mxu1 %v1224_v9  ;;  %v1228_v18 = vpack.c.bf16 %v1687_v16, %v1684_v15  ;;  %v1698_v20 = vld [vmem:[%s1640_s11 + $0x20] sm:$0xff]  ;;  %v1708_v24 = vld [vmem:[%s1640_s11 + $0x30] sm:$0xff]  ;;  %s1406_s13 = scalar_lea.vmem %s1405_s12, 4096 }
  0x3f   : > { %1223 = vmatpush1.bf16.msra.mxu0 %v1222_v10  ;;  %v1695_v19 = vld [vmem:[%s1640_s11 + $0x78] sm:$0xff]  ;;  %v1701_v21 = vld [vmem:[%s1640_s11 + $0x60] sm:$0xff]  ;;  %v1711_v25 = vld [vmem:[%s1640_s11 + $0x70] sm:$0xff]  ;;  %s1774_s11 = scalar_lea.vmem [#allocation5], %s1175_s28  ;;  %s1219_s28 = sshll.u32 %s1474_s21, 11 }
  0x40   : > { %1227 = vmatpush1.bf16.msra.mxu1 %v1226_v14  ;;  %v1232_v22 = vpack.c.bf16 %v1695_v19, %v1690_v17  ;;  %v1230_v23 = vpack.c.bf16 %v1701_v21, %v1698_v20  ;;  %v264_v26 = vld [vmem:[%s1864_s2] sm:$0x3]  ;;  %1229 = vmatprep.subr.bf16.mxu0 %v1228_v18  ;;  %v1234_v27 = vpack.c.bf16 %v1711_v25, %v1708_v24  ;;  %v268_v29 = vld [vmem:[%s1866_s4 + $0x8] sm:$0xff]  ;;  %s1080_s30 = sshll.u32 %s1774_s11, 4  ;;  %s1807_s17 = scalar_lea.hbm %s1867_s5, %s1219_s28  ;;  %s1809_s30 = int_to_ptr.vmem [resolvable:$true] %s1080_s30 }
  0x41   : > { %287 = vperm.xlu0 %1304, %v264_v26   ;;  %v267_v28 = vld [vmem:[%s1866_s4] sm:$0xff]  ;;  %593 = vperm.xlu1 %1305, %v268_v29   ;;  %v266_v55 = vld [vmem:[%s1865_s3 + $0x8] sm:$0xff]  ;;  %s1065_s21 = scalar_lea.sflag [#allocation4], %s1634_s29  ;;  %s1400_s24 = scalar_lea.vmem %s1809_s30, 2048 }
  0x42   : > { %1177 = vmatmul.mubr.msk.f32.vlgmr.msra.gmra.mrb[0].mxu0 %vm290_vm0, %v263_v13  ;;  %1233 = vmatprep.subr.bf16.mxu1 %v1232_v22  ;;  %v265_v46 = vld [vmem:[%s1865_s3] sm:$0xff]  ;;  %p1401_p8 = scmp.ne.s32.totalorder %s1809_s30, %s1400_s24  ;;  %p1407_p6 = scmp.lt.s32.totalorder %s1809_s30, %s1405_s12 }
  0x43   : > { %1178 = vmatmul.mubr.msk.f32.vlgmr.msra.gmra.mrb[0].mxu1 %vm290_vm0, %v263_v13  ;;  %1231 = vmatpush1.bf16.msra.mxu0 %v1230_v23  ;;  %p1408_p13 = scmp.lt.s32.totalorder %s1406_s13, %s1400_s24 }
  0x44   : > { %1235 = vmatpush1.bf16.msra.mxu1 %v1234_v27  ;;  %500 = vmatprep.mubr.f32.mxu0 %v1487_v0  ;;  %p1402_p11 = pnand %p1401_p8, %p1875_p9 }
  0x45   : > { %571 = vmatprep.mubr.f32.mxu1 %v1487_v0  ;;  %588 = vperm.xlu0 %1304, %v267_v28   ;;  %p1409_p2 = por %p1408_p13, %p1407_p6 }
  0x46   : > { %1179 = vmatmul.mubr.msk.f32.vlgmr.msra.gmra.mrb[2].mxu0 %vm290_vm0, %v263_v13  ;;  %p1403_p0 = pneg %p1402_p11 }
  0x47   : > { %1180 = vmatmul.mubr.msk.f32.vlgmr.msra.gmra.mrb[2].mxu1 %vm290_vm0, %v263_v13  ;;  %692 = vmatprep.mubr.f32.mxu0 %v1487_v0 }
  0x48   : > { %769 = vmatprep.mubr.f32.mxu1 %v1487_v0  ;;  %p1410_p5 = pnand %p1409_p2, %p1403_p0 }
  0xc0   : > { %v288_v30 = vpop.permute.xlu0 %287  ;;  %v1760_v5 = vpop.permute.xlu1 %593 }
  0xc4   : > { %v589_v57 = vpop.permute.xlu0 %588 }
 0x115   : > { %v360_v31 = vpop.f32.mrb[0].mxu0 }
 0x116   : > { %v361_v32 = vadd.f32 %v360_v31, %v288_v30  ;;  %v431_v33 = vpop.f32.mrb[0].mxu1  ;;  %v362_v34 = vpop.f32.mrb[1].mxu0 }
 0x117   : > { %v432_v35 = vadd.f32 %v431_v33, %v288_v30  ;;  %v363_v36 = vadd.f32 %v362_v34, %v288_v30  ;;  %v433_v37 = vpop.f32.mrb[1].mxu1 }
 0x118   : > { %v434_v38 = vadd.f32 %v433_v37, %v288_v30  ;;  %v578_v41 = vmax.f32 %v361_v32, 0.0 }
 0x119   : > { %v579_v39 = vmax.f32 %v363_v36, 0.0  ;;  %v502_v40 = vpop.f32.mrb[2].mxu0  ;;  %v580_v47 = vmax.f32 %v432_v35, 0.0 }
 0x11a   : > { %v581_v42 = vmax.f32 %v434_v38, 0.0  ;;  %v503_v43 = vadd.f32 %v502_v40, %v288_v30  ;;  %v573_v44 = vpop.f32.mrb[2].mxu1  ;;  %v504_v45 = vpop.f32.mrb[3].mxu0 }
 0x11b   : > { %v574_v48 = vadd.f32 %v573_v44, %v288_v30  ;;  %v505_v49 = vadd.f32 %v504_v45, %v288_v30  ;;  %v575_v50 = vpop.f32.mrb[3].mxu1  ;;  %1181 = vmatprep.subr.msk.mxu0 %vm603_vm1, %v579_v39 }
 0x11c   : > { %v576_v51 = vadd.f32 %v575_v50, %v288_v30  ;;  %1185 = vmatprep.subr.msk.mxu1 %vm603_vm1, %v581_v42  ;;  %1182 = vmatpush1.msk.msra.mxu0 %vm603_vm1, %v578_v41  ;;  %v582_v53 = vmax.f32 %v503_v43, 0.0 }
 0x11d   : > { %v583_v52 = vmax.f32 %v505_v49, 0.0  ;;  %1186 = vmatpush1.msk.msra.mxu1 %vm603_vm1, %v580_v47  ;;  %1183 = vmatmul.mubr.msk.f32.vlgmr.msra.gmra.mrb[4].mxu0 %vm596_vm2, %v265_v46  ;;  %v584_v56 = vmax.f32 %v574_v48, 0.0 }
 0x11e   : > { %v585_v54 = vmax.f32 %v576_v51, 0.0  ;;  %1187 = vmatmul.mubr.msk.f32.vlgmr.msra.gmra.mrb[4].mxu1 %vm596_vm2, %v265_v46  ;;  %698 = vmatprep.mubr.f32.mxu0 %v1487_v0 }
 0x11f   : > { %1189 = vmatprep.subr.msk.mxu0 %vm603_vm1, %v583_v52  ;;  %775 = vmatprep.mubr.f32.mxu1 %v1487_v0 }
 0x120   : > { %1193 = vmatprep.subr.msk.mxu1 %vm603_vm1, %v585_v54  ;;  %1190 = vmatpush1.msk.msra.mxu0 %vm603_vm1, %v582_v53 }
 0x121   : > { %1194 = vmatpush1.msk.msra.mxu1 %vm603_vm1, %v584_v56  ;;  %1184 = vmatmul.mubr.msk.f32.gmra.mrb[6].mxu0 %vm596_vm2, %v266_v55 }
 0x122   : > { %1188 = vmatmul.mubr.msk.f32.gmra.mrb[6].mxu1 %vm596_vm2, %v266_v55  ;;  %846 = vmatprep.mubr.f32.mxu0 %v1487_v0 }
 0x123   : > { %923 = vmatprep.mubr.f32.mxu1 %v1487_v0 }
 0x125   : > { %1191 = vmatmul.mubr.msk.f32.vlgmr.msra.gmra.mrb[8].mxu0 %vm596_vm2, %v265_v46 }
 0x126   : > { %1195 = vmatmul.mubr.msk.f32.vlgmr.msra.gmra.mrb[8].mxu1 %vm596_vm2, %v265_v46  ;;  %852 = vmatprep.mubr.f32.mxu0 %v1487_v0 }
 0x127   : > { %929 = vmatprep.mubr.f32.mxu1 %v1487_v0 }
 0x129   : > { %1192 = vmatmul.mubr.msk.f32.gmra.mrb[10].mxu0 %vm596_vm2, %v266_v55 }
 0x12a   : > { %1196 = vmatmul.mubr.msk.f32.gmra.mrb[10].mxu1 %vm596_vm2, %v266_v55 }
 0x1f0   : > { %v694_v58 = vpop.f32.mrb[4].mxu0 }
 0x1f1   : > { %v695_v59 = vadd.f32 %v694_v58, %v589_v57  ;;  %v771_v60 = vpop.f32.mrb[4].mxu1  ;;  %v696_v61 = vpop.f32.mrb[5].mxu0 }
 0x1f2   : > { %v772_v62 = vadd.f32 %v771_v60, %v589_v57  ;;  %v697_v63 = vadd.f32 %v696_v61, %v589_v57  ;;  %v773_v1 = vpop.f32.mrb[5].mxu1 }
 0x1f3   : > { %v1197_v9 = vmul.f32 -1.442695, %v695_v59  ;;  %v774_v10 = vadd.f32 %v773_v1, %v589_v57 }
 0x1f4   : > { %v1199_v13 = vmul.f32 -1.442695, %v772_v62  ;;  %v1198_v14 = vmul.f32 -1.442695, %v697_v63  ;;  %v700_v18 = vpop.f32.mrb[6].mxu0 }
 0x1f5   : > { %1306 = vpow2.f32 %v1197_v9  ;;  %v1200_v0 = vmul.f32 -1.442695, %v774_v10  ;;  %v777_v22 = vpop.f32.mrb[6].mxu1  ;;  %v701_v23 = vadd.f32 %v700_v18, %v1760_v5  ;;  %v702_v26 = vpop.f32.mrb[7].mxu0 }
 0x1f6   : > { %1308 = vpow2.f32 %v1199_v13  ;;  %v778_v27 = vadd.f32 %v777_v22, %v1760_v5  ;;  %v703_v28 = vadd.f32 %v702_v26, %v1760_v5  ;;  %v779_v29 = vpop.f32.mrb[7].mxu1 }
 0x1f7   : > { %1310 = vpow2.f32 %v1198_v14  ;;  %v1205_v30 = vmul.f32 -1.442695, %v701_v23  ;;  %v780_v31 = vadd.f32 %v779_v29, %v1760_v5 }
 0x1f8   : > { %1312 = vpow2.f32 %v1200_v0  ;;  %v1207_v32 = vmul.f32 -1.442695, %v778_v27  ;;  %v1206_v33 = vmul.f32 -1.442695, %v703_v28  ;;  %v848_v34 = vpop.f32.mrb[8].mxu0 }
 0x1f9   : > { %1314 = vpow2.f32 %v1205_v30  ;;  %v1208_v35 = vmul.f32 -1.442695, %v780_v31  ;;  %v849_v36 = vadd.f32 %v848_v34, %v589_v57  ;;  %v925_v37 = vpop.f32.mrb[8].mxu1  ;;  %v850_v38 = vpop.f32.mrb[9].mxu0 }
 0x1fa   : > { %1316 = vpow2.f32 %v1207_v32  ;;  %v926_v39 = vadd.f32 %v925_v37, %v589_v57  ;;  %v851_v40 = vadd.f32 %v850_v38, %v589_v57  ;;  %v927_v41 = vpop.f32.mrb[9].mxu1 }
 0x1fb   : > { %1318 = vpow2.f32 %v1206_v33  ;;  %v1201_v42 = vmul.f32 -1.442695, %v849_v36  ;;  %v928_v43 = vadd.f32 %v927_v41, %v589_v57 }
 0x1fc   : > { %1320 = vpow2.f32 %v1208_v35  ;;  %v1203_v44 = vmul.f32 -1.442695, %v926_v39  ;;  %v1202_v45 = vmul.f32 -1.442695, %v851_v40  ;;  %v854_v46 = vpop.f32.mrb[10].mxu0 }
 0x1fd   : > { %1322 = vpow2.f32 %v1201_v42  ;;  %v1204_v47 = vmul.f32 -1.442695, %v928_v43  ;;  %v855_v48 = vadd.f32 %v854_v46, %v1760_v5  ;;  %v931_v49 = vpop.f32.mrb[10].mxu1  ;;  %v856_v50 = vpop.f32.mrb[11].mxu0 }
 0x1fe   : > { %1324 = vpow2.f32 %v1203_v44  ;;  %v933_v51 = vpop.f32.mrb[11].mxu1  ;;  %v932_v0 = vadd.f32 %v931_v49, %v1760_v5  ;;  %v857_v26 = vadd.f32 %v856_v50, %v1760_v5 }
 0x1ff   : > { %v1307_v52 = vpop.eup %1306  ;;  %1326 = vpow2.f32 %v1202_v45  ;;  %v1209_v53 = vmul.f32 -1.442695, %v855_v48  ;;  %v934_v29 = vadd.f32 %v933_v51, %v1760_v5 }
 0x200   : > { %v1309_v54 = vpop.eup %1308  ;;  %v984_v55 = vadd.f32 1.0, %v1307_v52  ;;  %1328 = vpow2.f32 %v1204_v47  ;;  %v1211_v34 = vmul.f32 -1.442695, %v932_v0  ;;  %v1210_v37 = vmul.f32 -1.442695, %v857_v26 }
 0x201   : > { %v1311_v56 = vpop.eup %1310  ;;  %v986_v57 = vadd.f32 1.0, %v1309_v54  ;;  %1330 = vpow2.f32 %v1209_v53  ;;  %v1212_v40 = vmul.f32 -1.442695, %v934_v29 }
 0x202   : > { %v1313_v58 = vpop.eup %1312  ;;  %1332 = vrcp.f32 %v984_v55  ;;  %v985_v59 = vadd.f32 1.0, %v1311_v56 }
 0x203   : > { %v1315_v60 = vpop.eup %1314  ;;  %1334 = vrcp.f32 %v986_v57  ;;  %v987_v61 = vadd.f32 1.0, %v1313_v58 }
 0x204   : > { %v1317_v62 = vpop.eup %1316  ;;  %1336 = vrcp.f32 %v985_v59  ;;  %v992_v63 = vadd.f32 1.0, %v1315_v60 }
 0x205   : > { %v1319_v1 = vpop.eup %1318  ;;  %1338 = vrcp.f32 %v987_v61  ;;  %v994_v9 = vadd.f32 1.0, %v1317_v62 }
 0x206   : > { %v1321_v10 = vpop.eup %1320  ;;  %1340 = vrcp.f32 %v992_v63  ;;  %v993_v13 = vadd.f32 1.0, %v1319_v1 }
 0x207   : > { %v1323_v14 = vpop.eup %1322  ;;  %1342 = vrcp.f32 %v994_v9  ;;  %v995_v18 = vadd.f32 1.0, %v1321_v10 }
 0x208   : > { %v1325_v22 = vpop.eup %1324  ;;  %1344 = vrcp.f32 %v993_v13  ;;  %v988_v23 = vadd.f32 1.0, %v1323_v14 }
 0x209   : > { %v1327_v27 = vpop.eup %1326  ;;  %1346 = vrcp.f32 %v995_v18  ;;  %v990_v28 = vadd.f32 1.0, %v1325_v22 }
 0x20a   : > { %v1329_v30 = vpop.eup %1328  ;;  %1348 = vrcp.f32 %v988_v23  ;;  %v989_v31 = vadd.f32 1.0, %v1327_v27 }
 0x20b   : > { %v1331_v32 = vpop.eup %1330  ;;  %1350 = vrcp.f32 %v990_v28  ;;  %v991_v33 = vadd.f32 1.0, %v1329_v30 }
 0x20c   : > { %v1333_v35 = vpop.eup %1332  ;;  %1352 = vrcp.f32 %v989_v31  ;;  %v996_v36 = vadd.f32 1.0, %v1331_v32 }
 0x20d   : > { %v1335_v38 = vpop.eup %1334  ;;  %v1032_v39 = vmul.f32 %v1333_v35, %v1663_v7  ;;  %1354 = vrcp.f32 %v991_v33 }
 0x20e   : > { %v1337_v41 = vpop.eup %1336  ;;  %v1034_v5 = vmul.f32 %v1335_v38, %v1673_v11  ;;  %1356 = vrcp.f32 %v996_v36 }
 0x20f   : > { %v1339_v42 = vpop.eup %1338  ;;  %1048 = vst [vmem:[%s1774_s11] sm:$0xff] %v1032_v39  ;;  %v1033_v43 = vmul.f32 %v1337_v41, %v1649_v2  ;;  %1358 = vpow2.f32 %v1211_v34 }
 0x210   : > { %v1341_v7 = vpop.eup %1340  ;;  %1050 = vst [vmem:[%s1774_s11 + $0x10] sm:$0xff] %v1034_v5  ;;  %v1035_v44 = vmul.f32 %v1339_v42, %v1655_v4  ;;  %1360 = vpow2.f32 %v1210_v37 }
 0x211   : > { %v1343_v11 = vpop.eup %1342  ;;  %1049 = vst [vmem:[%s1774_s11 + $0x8] sm:$0xff] %v1033_v43  ;;  %v1040_v45 = vmul.f32 %v1341_v7, %v1666_v8  ;;  %1362 = vpow2.f32 %v1212_v40 }
 0x212   : > { %v1345_v46 = vpop.eup %1344  ;;  %1051 = vst [vmem:[%s1774_s11 + $0x18] sm:$0xff] %v1035_v44  ;;  %v1042_v47 = vmul.f32 %v1343_v11, %v1676_v12 }
 0x213   : > { %v1347_v2 = vpop.eup %1346  ;;  %1056 = vst [vmem:[%s1774_s11 + $0x40] sm:$0xff] %v1040_v45  ;;  %v1041_v48 = vmul.f32 %v1345_v46, %v1652_v3 }
 0x214   : > { %v1349_v49 = vpop.eup %1348  ;;  %1058 = vst [vmem:[%s1774_s11 + $0x50] sm:$0xff] %v1042_v47  ;;  %v1043_v4 = vmul.f32 %v1347_v2, %v1660_v6 }
 0x215   : > { %v1351_v50 = vpop.eup %1350  ;;  %1057 = vst [vmem:[%s1774_s11 + $0x48] sm:$0xff] %v1041_v48  ;;  %v1036_v8 = vmul.f32 %v1349_v49, %v1698_v20 }
 0x216   : > { %v1353_v51 = vpop.eup %1352  ;;  %1059 = vst [vmem:[%s1774_s11 + $0x58] sm:$0xff] %v1043_v4  ;;  %v1038_v12 = vmul.f32 %v1351_v50, %v1708_v24 }
 0x217   : > { %v1355_v52 = vpop.eup %1354  ;;  %1052 = vst [vmem:[%s1774_s11 + $0x20] sm:$0xff] %v1036_v8  ;;  %v1037_v53 = vmul.f32 %v1353_v51, %v1684_v15 }
 0x218   : > { %v1357_v3 = vpop.eup %1356  ;;  %1054 = vst [vmem:[%s1774_s11 + $0x30] sm:$0xff] %v1038_v12  ;;  %v1039_v6 = vmul.f32 %v1355_v52, %v1690_v17 }
 0x219   : > { %v1359_v54 = vpop.eup %1358  ;;  %1053 = vst [vmem:[%s1774_s11 + $0x28] sm:$0xff] %v1037_v53  ;;  %v1044_v55 = vmul.f32 %v1357_v3, %v1701_v21 }
 0x21a   : > { %v1361_v20 = vpop.eup %1360  ;;  %1055 = vst [vmem:[%s1774_s11 + $0x38] sm:$0xff] %v1039_v6  ;;  %v998_v56 = vadd.f32 1.0, %v1359_v54 }
 0x21b   : > { %v1363_v57 = vpop.eup %1362  ;;  %1060 = vst [vmem:[%s1774_s11 + $0x60] sm:$0xff] %v1044_v55  ;;  %v997_v24 = vadd.f32 1.0, %v1361_v20 }
 0x21c   : > { %1364 = vrcp.f32 %v998_v56  ;;  %v999_v15 = vadd.f32 1.0, %v1363_v57 }
 0x21d   : > { %1366 = vrcp.f32 %v997_v24 }
 0x21e   : > { %1368 = vrcp.f32 %v999_v15 }
 0x226   : > { %v1365_v17 = vpop.eup %1364 }
 0x227   : > { %v1367_v58 = vpop.eup %1366  ;;  %v1046_v21 = vmul.f32 %v1365_v17, %v1711_v25 }
 0x228   : > { %v1369_v59 = vpop.eup %1368  ;;  %v1045_v60 = vmul.f32 %v1367_v58, %v1687_v16 }
 0x229   : > { %1062 = vst [vmem:[%s1774_s11 + $0x70] sm:$0xff] %v1046_v21  ;;  %v1047_v61 = vmul.f32 %v1369_v59, %v1695_v19 }
 0x22a   : > { %1061 = vst [vmem:[%s1774_s11 + $0x68] sm:$0xff] %v1045_v60 }
 0x22b   : > { %1063 = vst [vmem:[%s1774_s11 + $0x78] sm:$0xff] %v1047_v61 }
 0x22c   : > { %1413 = shalt.err (!%p1410_p5)
}
 0x22d   : > { %s1414_s15 = scalar_lea.hbm %s1807_s17, 2048  ;;  %s1418_s10 = scalar_lea.hbm %s1867_s5, 4096 }
 0x22e   : > { %p1415_p4 = scmp.ne.s32.totalorder %s1807_s17, %s1414_s15  ;;  %p1419_p12 = scmp.lt.u32.totalorder %s1807_s17, %s1867_s5 }
 0x22f   : > { %p1420_p1 = scmp.lt.u32.totalorder %s1418_s10, %s1414_s15  ;;  %p1422_p8 = scmp.lt.u32.totalorder %s1414_s15, %s1807_s17 }
 0x230   : > { %p1416_p7 = pnand %p1415_p4, %p1875_p9 }
 0x231   : > { %p1421_p3 = por %p1420_p1, %p1419_p12 }
 0x232   : > { %p1417_p10 = pneg %p1416_p7 }
 0x233   : > { %p1423_p11 = por %p1422_p8, %p1421_p3 }
 0x235   : > { %p1424_p0 = pnand %p1423_p11, %p1417_p10 }
 0x237   : > { %1427 = shalt.err (!%p1424_p0)
}
 0x238   : > { %s1490_s14 = smov 1024   ;;  %s1491_s16 = smov 64  }
 0x239   : > { %1238 = dma.vmem_to_hbm [thread:$0]  (%p1875_p9), %s1809_s30, 2048, %s1807_s17, %s1065_s21, %s1490_s14, %s1490_s14, %s1491_s16  }
 0x23a PF: > { %s1095_s24 = sand.u32 1, %s1462_s18   ;;  %p1876_p6 = scmp.ne.s32.totalorder %s1872_s8, 0 }
 0x23b   : > { %p1877_p13 = scmp.ge.s32.totalorder %s1482_s23, 2  ;;  %s1096_s9 = scalar_lea.sflag [#allocation4], %s1095_s24 }
 0x23d   : > { %p1245_p2 = pnand %p1877_p13, %p1876_p6 }
 0x23f   : > { %1457 = dma.done.wait (!%p1245_p2), %s1096_s9, 2048  }
 0x240   : > { %1459 = vsyncadd (!%p1245_p2), %s1096_s9, 4294965248  ;;  %s21_s23 = sadd.s32 1, %s1482_s23   ;;  %s1878_s18 = smov %s1466_s19 }
 0x241   : > { %p18_p5 = scmp.ge.s32.totalorder %s21_s23, 4   ;;  %s1879_s19 = smov %s1470_s20 }
 0x242   : > { %s1880_s20 = smov %s1578_s7  ;;  %s1881_s21 = smov %s1478_s22 }
 0x243   : > { %s1882_s22 = smov %s1884_s26  ;;  %20 = sbr.rel (!%p18_p5) target bundleno = 6 (0x6), region = 85 }
 0x24a   :  { %1101 = vsyncpa [#allocation3], 1 }
 0x24b   :  { %1103 = vsyncpa [#allocation3 + $0x1], 1 }
 0x24c   :  { %1104 = vsyncpa [#allocation4], 1 }
 0x24d   :  { %1106 = vsyncpa [#allocation4 + $0x1], 1 }

</bundles_post_ra>
